<compile_context>
chip_gen: v7x
topology: tpu7x:2x2x1
jax: 0.10.0
libtpu: 0.0.40
codegen_flags: <defaults>
</compile_context>

<pallas_src>
import functools

import jax
import jax.numpy as jnp
from jax.experimental import pallas as pl
from jax.experimental.pallas import tpu as pltpu


# ---------------------------------------------------------------------------
# Kernel
# ---------------------------------------------------------------------------
def _mish_fast(x):
    # mish(x) = x * tanh(softplus(x)) = x * (y^2 - 1) / (y^2 + 1),  y = 1 + e^x
    # Clamping the exponent at 20 keeps exp finite and is exact
    # (tanh(softplus(20)) == 1.0 in both f32 and bf16).
    e = jnp.exp(jnp.minimum(x, 20.0))          # EUP (bf16-native on v6e/v7x)
    y = 1.0 + e
    y2 = y * y
    num = x * (y2 - 1.0)
    if x.dtype == jnp.float32:
        # f32 path (v5e and older): EUP approx reciprocal is effectively free.
        return num * pl.reciprocal(y2 + 1.0, approx=True)
    # bf16 path (v6e/v7x): stay in bf16 end-to-end to halve EUP/VALU pushes.
    return num / (y2 + 1.0)


def _critic_kernel(x_ref,
                   w1_ref, b1_ref,
                   w2_ref, b2_ref,
                   w3_ref, b3_ref,
                   w4_ref, b4_ref,
                   q_ref, *, act_dtype):
    H = w2_ref.shape[-1]
    f32 = jnp.float32

    # Layer 1: both Q heads fused along the output dim -> one wide MXU matmul.
    h = jnp.dot(x_ref[...], w1_ref[...], preferred_element_type=f32) + b1_ref[...]
    h = _mish_fast(h.astype(act_dtype))                         # [TB, 2H]

    def head(h_head, idx):
        h2 = jnp.dot(h_head.astype(jnp.bfloat16), w2_ref[idx],
                     preferred_element_type=f32) + b2_ref[idx]
        h2 = _mish_fast(h2.astype(act_dtype))
        h3 = jnp.dot(h2.astype(jnp.bfloat16), w3_ref[idx],
                     preferred_element_type=f32) + b3_ref[idx]
        h3 = _mish_fast(h3.astype(act_dtype))
        # Layer 4 has a single output column: an MXU dot would cost a full
        # pass set for 1/256 useful lanes -> VPU multiply + XLU lane reduce.
        return jnp.sum(h3.astype(f32) * w4_ref[idx], axis=-1, keepdims=True)

    qa = head(h[:, :H], 0)                                      # [TB, 1]
    qb = head(h[:, H:], 1)                                      # [TB, 1]
    # Single lane-packed [TB, 2] output slab.
    q_ref[...] = jnp.concatenate([qa, qb], axis=-1) + b4_ref[...]


# ---------------------------------------------------------------------------
# Wrapper
# ---------------------------------------------------------------------------
def _act_dtype():
    """bf16 activation math on chips with bf16 VPU/EUP (v6e+); f32 otherwise."""
    try:
        kind = jax.devices()[0].device_kind.lower()
    except Exception:
        return jnp.float32
    if any(tag in kind for tag in ("v2", "v3", "v4", "v5")):
        return jnp.float32
    return jnp.bfloat16


def _pack_params(params):
    """Pack the 16 PyTorch-style (W, b) tensors into 8 kernel operands."""
    (w1a, b1a), (w2a, b2a), (w3a, b3a), (w4a, b4a) = params["q1"]
    (w1b, b1b), (w2b, b2b), (w3b, b3b), (w4b, b4b) = params["q2"]
    bf16, f32 = jnp.bfloat16, jnp.float32

    w1 = jnp.concatenate([w1a, w1b], axis=1).astype(bf16)       # [in, 2H]
    b1 = jnp.concatenate([b1a, b1b], axis=1).astype(f32)        # [1, 2H]
    w2 = jnp.stack([w2a, w2b]).astype(bf16)                     # [2, H, H]
    b2 = jnp.stack([b2a, b2b]).astype(f32)                      # [2, 1, H]
    w3 = jnp.stack([w3a, w3b]).astype(bf16)                     # [2, H, H]
    b3 = jnp.stack([b3a, b3b]).astype(f32)                      # [2, 1, H]
    w4 = jnp.stack([w4a.T, w4b.T]).astype(f32)                  # [2, 1, H] (row form)
    b4 = jnp.concatenate([b4a, b4b], axis=1).astype(f32)        # [1, 2]
    return (w1, b1, w2, b2, w3, b3, w4, b4)


def _pick_batch_tile(B, tb_max=2048):
    """Batch tile: big (amortize ~0.35us/step), multiple of 8, and split into
    >= 2 grid steps when possible so v7x megacore sees parallel work."""
    if B > tb_max:
        return tb_max
    half = (-(-B // 2) + 7) // 8 * 8          # round_up(cdiv(B, 2), 8)
    return half if 8 <= half < B else B


def _critic_q_both(state, action, params):
    """Returns q = [q1 | q2] as one [B, 2] f32 array."""
    B = state.shape[0]
    in_dim = state.shape[1] + action.shape[1]
    packed = _pack_params(params)
    act_dtype = _act_dtype()

    # Pre-concatenated bf16 input (tiny HBM slab; lets layer 1 be one matmul).
    x = jnp.concatenate([state, action], axis=-1).astype(jnp.bfloat16)

    TB = _pick_batch_tile(B)
    grid = (pl.cdiv(B, TB),)

    def resident_spec(a):
        nd = a.ndim
        return pl.BlockSpec(a.shape, lambda i, nd=nd: (0,) * nd)

    in_specs = [pl.BlockSpec((TB, in_dim), lambda i: (i, 0))]
    in_specs += [resident_spec(p) for p in packed]

    kernel = functools.partial(_critic_kernel, act_dtype=act_dtype)

    q = pl.pallas_call(
        kernel,
        out_shape=jax.ShapeDtypeStruct((B, 2), jnp.float32),
        grid=grid,
        in_specs=in_specs,
        out_specs=pl.BlockSpec((TB, 2), lambda i: (i, 0)),
        compiler_params=pltpu.CompilerParams(
            dimension_semantics=("parallel",),
            # v5e's default scoped VMEM is 16 MiB; bump when tiles get large.
            vmem_limit_bytes=(32 * 1024 * 1024) if TB >= 1024 else None,
        ),
    )(x, *packed)
    return q


def critic_forward(state, action, params):
    q = _critic_q_both(state, action, params)
    return q[:, 0:1], q[:, 1:2]


def critic_q_min(state, action, params):
    q = _critic_q_both(state, action, params)
    return jnp.min(q, axis=-1, keepdims=True)


# ---------------------------------------------------------------------------
# Param init (PyTorch nn.Linear-style uniform ranges) and f32 reference
# ---------------------------------------------------------------------------
def init_critic_params(key, state_dim, action_dim, hidden_dim=256):
    in_dim = state_dim + action_dim
    dims = [(in_dim, hidden_dim), (hidden_dim, hidden_dim),
            (hidden_dim, hidden_dim), (hidden_dim, 1)]
    params = {}
    for head in ("q1", "q2"):
        layers = []
        for (din, dout) in dims:
            key, kw, kb = jax.random.split(key, 3)
            bound = 1.0 / jnp.sqrt(float(din))
            w = jax.random.uniform(kw, (din, dout), jnp.float32,
                                   minval=-bound, maxval=bound)
            b = jax.random.uniform(kb, (1, dout), jnp.float32,
                                   minval=-bound, maxval=bound)
            layers.append((w, b))
        params[head] = layers
    return params


def _mish_ref(x):
    return x * jnp.tanh(jax.nn.softplus(x))


def _reference_forward(state, action, params):
    x = jnp.concatenate([state, action], axis=-1).astype(jnp.float32)

    def mlp(layers):
        h = x
        for i, (w, b) in enumerate(layers):
            h = h @ w + b
            if i < len(layers) - 1:
                h = _mish_ref(h)
        return h

    return mlp(params["q1"]), mlp(params["q2"])


if __name__ == "__main__":
    batch = 8
    state_dim = 12
    action_dim = 4
    hidden_dim = 32   # production uses 256 (multiple of 128 -> aligned tiles)

    key = jax.random.PRNGKey(0)
    k_state, k_action, k_params = jax.random.split(key, 3)
    state = jax.random.normal(k_state, (batch, state_dim), jnp.float32)
    action = jax.random.normal(k_action, (batch, action_dim), jnp.float32)
    params = init_critic_params(k_params, state_dim, action_dim, hidden_dim)

    q1, q2 = critic_forward(state, action, params)
    jax.block_until_ready((q1, q2))

    q1_ref, q2_ref = _reference_forward(state, action, params)
    assert q1.shape == (batch, 1) and q2.shape == (batch, 1)
    # bf16 matmul operands (+ bf16 Mish on v6e/v7x) -> loose tolerance vs f32 ref.
    assert jnp.allclose(q1, q1_ref, atol=8e-2, rtol=8e-2)
    assert jnp.allclose(q2, q2_ref, atol=8e-2, rtol=8e-2)

    qmin = critic_q_min(state, action, params)
    jax.block_until_ready(qmin)
    assert jnp.allclose(qmin, jnp.minimum(q1_ref, q2_ref), atol=8e-2, rtol=8e-2)

    print("KERNEL_OK")
</pallas_src>

<mosaic_0001>
module attributes {stable_mosaic.version = 11 : i64} {
  func.func @_critic_kernel(%arg0: i32, %arg1: memref<8x16xbf16, #tpu.memory_space<vmem>>, %arg2: memref<16x64xbf16, #tpu.memory_space<vmem>>, %arg3: memref<1x64xf32, #tpu.memory_space<vmem>>, %arg4: memref<2x32x32xbf16, #tpu.memory_space<vmem>>, %arg5: memref<2x1x32xf32, #tpu.memory_space<vmem>>, %arg6: memref<2x32x32xbf16, #tpu.memory_space<vmem>>, %arg7: memref<2x1x32xf32, #tpu.memory_space<vmem>>, %arg8: memref<2x1x32xf32, #tpu.memory_space<vmem>>, %arg9: memref<1x2xf32, #tpu.memory_space<vmem>>, %arg10: memref<8x2xf32, #tpu.memory_space<vmem>>) attributes {dimension_semantics = [#tpu.dimension_semantics<parallel>], iteration_bounds = array<i64: 1>, scalar_prefetch = 0 : i64, scratch_operands = 0 : i64, tpu.core_type = #tpu.core_type<tc>, window_params = [{transform_indices = @transform_0, window_bounds = array<i64: 8, 16>}, {pipeline_mode = #tpu.pipeline_mode<synchronous>, transform_indices = @transform_1, window_bounds = array<i64: 16, 64>}, {pipeline_mode = #tpu.pipeline_mode<synchronous>, transform_indices = @transform_2, window_bounds = array<i64: 1, 64>}, {pipeline_mode = #tpu.pipeline_mode<synchronous>, transform_indices = @transform_3, window_bounds = array<i64: 2, 32, 32>}, {pipeline_mode = #tpu.pipeline_mode<synchronous>, transform_indices = @transform_4, window_bounds = array<i64: 2, 1, 32>}, {pipeline_mode = #tpu.pipeline_mode<synchronous>, transform_indices = @transform_5, window_bounds = array<i64: 2, 32, 32>}, {pipeline_mode = #tpu.pipeline_mode<synchronous>, transform_indices = @transform_6, window_bounds = array<i64: 2, 1, 32>}, {pipeline_mode = #tpu.pipeline_mode<synchronous>, transform_indices = @transform_7, window_bounds = array<i64: 2, 1, 32>}, {pipeline_mode = #tpu.pipeline_mode<synchronous>, transform_indices = @transform_8, window_bounds = array<i64: 1, 2>}, {transform_indices = @transform_9, window_bounds = array<i64: 8, 2>}]} {
    %c0 = arith.constant 0 : index
    %c0_0 = arith.constant 0 : index
    %0 = vector.load %arg1[%c0, %c0_0] : memref<8x16xbf16, #tpu.memory_space<vmem>>, vector<8x16xbf16>
    %c0_1 = arith.constant 0 : index
    %c0_2 = arith.constant 0 : index
    %1 = vector.load %arg2[%c0_1, %c0_2] : memref<16x64xbf16, #tpu.memory_space<vmem>>, vector<16x64xbf16>
    %cst = arith.constant dense<0.000000e+00> : vector<8x64xf32>
    %2 = tpu.matmul %0, %1, %cst {dimension_numbers = #tpu.dot_dimension_numbers<[1], [0], [0], [1], [0, 0, 1, 1], [], []>} : vector<8x16xbf16>, vector<16x64xbf16>, vector<8x64xf32> -> vector<8x64xf32>
    %c0_3 = arith.constant 0 : index
    %c0_4 = arith.constant 0 : index
    %3 = vector.load %arg3[%c0_3, %c0_4] : memref<1x64xf32, #tpu.memory_space<vmem>>, vector<1x64xf32>
    %4 = vector.broadcast %3 : vector<1x64xf32> to vector<8x64xf32>
    %5 = arith.addf %2, %4 : vector<8x64xf32>
    %6 = arith.truncf %5 : vector<8x64xf32> to vector<8x64xbf16>
    %cst_5 = arith.constant 2.000000e+01 : bf16
    %7 = vector.broadcast %cst_5 : bf16 to vector<8x64xbf16>
    %8 = arith.minimumf %6, %7 : vector<8x64xbf16>
    %9 = math.exp %8 : vector<8x64xbf16>
    %cst_6 = arith.constant 1.000000e+00 : bf16
    %10 = vector.broadcast %cst_6 : bf16 to vector<8x64xbf16>
    %11 = arith.addf %10, %9 : vector<8x64xbf16>
    %12 = arith.mulf %11, %11 : vector<8x64xbf16>
    %cst_7 = arith.constant 1.000000e+00 : bf16
    %13 = vector.broadcast %cst_7 : bf16 to vector<8x64xbf16>
    %14 = arith.subf %12, %13 : vector<8x64xbf16>
    %15 = arith.mulf %6, %14 : vector<8x64xbf16>
    %cst_8 = arith.constant 1.000000e+00 : bf16
    %16 = vector.broadcast %cst_8 : bf16 to vector<8x64xbf16>
    %17 = arith.addf %12, %16 : vector<8x64xbf16>
    %18 = arith.divf %15, %17 : vector<8x64xbf16>
    %19 = vector.extract_strided_slice %18 {offsets = [0, 0], sizes = [8, 32], strides = [1, 1]} : vector<8x64xbf16> to vector<8x32xbf16>
    %c0_9 = arith.constant 0 : index
    %c0_10 = arith.constant 0 : index
    %c0_11 = arith.constant 0 : index
    %20 = vector.load %arg4[%c0_9, %c0_10, %c0_11] : memref<2x32x32xbf16, #tpu.memory_space<vmem>>, vector<1x32x32xbf16>
    %21 = vector.shape_cast %20 : vector<1x32x32xbf16> to vector<32x32xbf16>
    %cst_12 = arith.constant dense<0.000000e+00> : vector<8x32xf32>
    %22 = tpu.matmul %19, %21, %cst_12 {dimension_numbers = #tpu.dot_dimension_numbers<[1], [0], [0], [1], [0, 0, 1, 1], [], []>} : vector<8x32xbf16>, vector<32x32xbf16>, vector<8x32xf32> -> vector<8x32xf32>
    %c0_13 = arith.constant 0 : index
    %c0_14 = arith.constant 0 : index
    %c0_15 = arith.constant 0 : index
    %23 = vector.load %arg5[%c0_13, %c0_14, %c0_15] : memref<2x1x32xf32, #tpu.memory_space<vmem>>, vector<1x1x32xf32>
    %24 = vector.shape_cast %23 : vector<1x1x32xf32> to vector<1x32xf32>
    %25 = vector.broadcast %24 : vector<1x32xf32> to vector<8x32xf32>
    %26 = arith.addf %22, %25 : vector<8x32xf32>
    %27 = arith.truncf %26 : vector<8x32xf32> to vector<8x32xbf16>
    %cst_16 = arith.constant 2.000000e+01 : bf16
    %28 = vector.broadcast %cst_16 : bf16 to vector<8x32xbf16>
    %29 = arith.minimumf %27, %28 : vector<8x32xbf16>
    %30 = math.exp %29 : vector<8x32xbf16>
    %cst_17 = arith.constant 1.000000e+00 : bf16
    %31 = vector.broadcast %cst_17 : bf16 to vector<8x32xbf16>
    %32 = arith.addf %31, %30 : vector<8x32xbf16>
    %33 = arith.mulf %32, %32 : vector<8x32xbf16>
    %cst_18 = arith.constant 1.000000e+00 : bf16
    %34 = vector.broadcast %cst_18 : bf16 to vector<8x32xbf16>
    %35 = arith.subf %33, %34 : vector<8x32xbf16>
    %36 = arith.mulf %27, %35 : vector<8x32xbf16>
    %cst_19 = arith.constant 1.000000e+00 : bf16
    %37 = vector.broadcast %cst_19 : bf16 to vector<8x32xbf16>
    %38 = arith.addf %33, %37 : vector<8x32xbf16>
    %39 = arith.divf %36, %38 : vector<8x32xbf16>
    %c0_20 = arith.constant 0 : index
    %c0_21 = arith.constant 0 : index
    %c0_22 = arith.constant 0 : index
    %40 = vector.load %arg6[%c0_20, %c0_21, %c0_22] : memref<2x32x32xbf16, #tpu.memory_space<vmem>>, vector<1x32x32xbf16>
    %41 = vector.shape_cast %40 : vector<1x32x32xbf16> to vector<32x32xbf16>
    %cst_23 = arith.constant dense<0.000000e+00> : vector<8x32xf32>
    %42 = tpu.matmul %39, %41, %cst_23 {dimension_numbers = #tpu.dot_dimension_numbers<[1], [0], [0], [1], [0, 0, 1, 1], [], []>} : vector<8x32xbf16>, vector<32x32xbf16>, vector<8x32xf32> -> vector<8x32xf32>
    %c0_24 = arith.constant 0 : index
    %c0_25 = arith.constant 0 : index
    %c0_26 = arith.constant 0 : index
    %43 = vector.load %arg7[%c0_24, %c0_25, %c0_26] : memref<2x1x32xf32, #tpu.memory_space<vmem>>, vector<1x1x32xf32>
    %44 = vector.shape_cast %43 : vector<1x1x32xf32> to vector<1x32xf32>
    %45 = vector.broadcast %44 : vector<1x32xf32> to vector<8x32xf32>
    %46 = arith.addf %42, %45 : vector<8x32xf32>
    %47 = arith.truncf %46 : vector<8x32xf32> to vector<8x32xbf16>
    %cst_27 = arith.constant 2.000000e+01 : bf16
    %48 = vector.broadcast %cst_27 : bf16 to vector<8x32xbf16>
    %49 = arith.minimumf %47, %48 : vector<8x32xbf16>
    %50 = math.exp %49 : vector<8x32xbf16>
    %cst_28 = arith.constant 1.000000e+00 : bf16
    %51 = vector.broadcast %cst_28 : bf16 to vector<8x32xbf16>
    %52 = arith.addf %51, %50 : vector<8x32xbf16>
    %53 = arith.mulf %52, %52 : vector<8x32xbf16>
    %cst_29 = arith.constant 1.000000e+00 : bf16
    %54 = vector.broadcast %cst_29 : bf16 to vector<8x32xbf16>
    %55 = arith.subf %53, %54 : vector<8x32xbf16>
    %56 = arith.mulf %47, %55 : vector<8x32xbf16>
    %cst_30 = arith.constant 1.000000e+00 : bf16
    %57 = vector.broadcast %cst_30 : bf16 to vector<8x32xbf16>
    %58 = arith.addf %53, %57 : vector<8x32xbf16>
    %59 = arith.divf %56, %58 : vector<8x32xbf16>
    %60 = arith.extf %59 : vector<8x32xbf16> to vector<8x32xf32>
    %c0_31 = arith.constant 0 : index
    %c0_32 = arith.constant 0 : index
    %c0_33 = arith.constant 0 : index
    %61 = vector.load %arg8[%c0_31, %c0_32, %c0_33] : memref<2x1x32xf32, #tpu.memory_space<vmem>>, vector<1x1x32xf32>
    %62 = vector.shape_cast %61 : vector<1x1x32xf32> to vector<1x32xf32>
    %63 = vector.broadcast %62 : vector<1x32xf32> to vector<8x32xf32>
    %64 = arith.mulf %60, %63 : vector<8x32xf32>
    %cst_34 = arith.constant dense<0.000000e+00> : vector<8xf32>
    %65 = vector.multi_reduction <add>, %64, %cst_34 [1] : vector<8x32xf32> to vector<8xf32>
    %66 = vector.shape_cast %65 : vector<8xf32> to vector<8x1xf32>
    %67 = vector.extract_strided_slice %18 {offsets = [0, 32], sizes = [8, 32], strides = [1, 1]} : vector<8x64xbf16> to vector<8x32xbf16>
    %c1 = arith.constant 1 : index
    %c0_35 = arith.constant 0 : index
    %c0_36 = arith.constant 0 : index
    %68 = vector.load %arg4[%c1, %c0_35, %c0_36] : memref<2x32x32xbf16, #tpu.memory_space<vmem>>, vector<1x32x32xbf16>
    %69 = vector.shape_cast %68 : vector<1x32x32xbf16> to vector<32x32xbf16>
    %cst_37 = arith.constant dense<0.000000e+00> : vector<8x32xf32>
    %70 = tpu.matmul %67, %69, %cst_37 {dimension_numbers = #tpu.dot_dimension_numbers<[1], [0], [0], [1], [0, 0, 1, 1], [], []>} : vector<8x32xbf16>, vector<32x32xbf16>, vector<8x32xf32> -> vector<8x32xf32>
    %c1_38 = arith.constant 1 : index
    %c0_39 = arith.constant 0 : index
    %c0_40 = arith.constant 0 : index
    %71 = vector.load %arg5[%c1_38, %c0_39, %c0_40] : memref<2x1x32xf32, #tpu.memory_space<vmem>>, vector<1x1x32xf32>
    %72 = vector.shape_cast %71 : vector<1x1x32xf32> to vector<1x32xf32>
    %73 = vector.broadcast %72 : vector<1x32xf32> to vector<8x32xf32>
    %74 = arith.addf %70, %73 : vector<8x32xf32>
    %75 = arith.truncf %74 : vector<8x32xf32> to vector<8x32xbf16>
    %cst_41 = arith.constant 2.000000e+01 : bf16
    %76 = vector.broadcast %cst_41 : bf16 to vector<8x32xbf16>
    %77 = arith.minimumf %75, %76 : vector<8x32xbf16>
    %78 = math.exp %77 : vector<8x32xbf16>
    %cst_42 = arith.constant 1.000000e+00 : bf16
    %79 = vector.broadcast %cst_42 : bf16 to vector<8x32xbf16>
    %80 = arith.addf %79, %78 : vector<8x32xbf16>
    %81 = arith.mulf %80, %80 : vector<8x32xbf16>
    %cst_43 = arith.constant 1.000000e+00 : bf16
    %82 = vector.broadcast %cst_43 : bf16 to vector<8x32xbf16>
    %83 = arith.subf %81, %82 : vector<8x32xbf16>
    %84 = arith.mulf %75, %83 : vector<8x32xbf16>
    %cst_44 = arith.constant 1.000000e+00 : bf16
    %85 = vector.broadcast %cst_44 : bf16 to vector<8x32xbf16>
    %86 = arith.addf %81, %85 : vector<8x32xbf16>
    %87 = arith.divf %84, %86 : vector<8x32xbf16>
    %c1_45 = arith.constant 1 : index
    %c0_46 = arith.constant 0 : index
    %c0_47 = arith.constant 0 : index
    %88 = vector.load %arg6[%c1_45, %c0_46, %c0_47] : memref<2x32x32xbf16, #tpu.memory_space<vmem>>, vector<1x32x32xbf16>
    %89 = vector.shape_cast %88 : vector<1x32x32xbf16> to vector<32x32xbf16>
    %cst_48 = arith.constant dense<0.000000e+00> : vector<8x32xf32>
    %90 = tpu.matmul %87, %89, %cst_48 {dimension_numbers = #tpu.dot_dimension_numbers<[1], [0], [0], [1], [0, 0, 1, 1], [], []>} : vector<8x32xbf16>, vector<32x32xbf16>, vector<8x32xf32> -> vector<8x32xf32>
    %c1_49 = arith.constant 1 : index
    %c0_50 = arith.constant 0 : index
    %c0_51 = arith.constant 0 : index
    %91 = vector.load %arg7[%c1_49, %c0_50, %c0_51] : memref<2x1x32xf32, #tpu.memory_space<vmem>>, vector<1x1x32xf32>
    %92 = vector.shape_cast %91 : vector<1x1x32xf32> to vector<1x32xf32>
    %93 = vector.broadcast %92 : vector<1x32xf32> to vector<8x32xf32>
    %94 = arith.addf %90, %93 : vector<8x32xf32>
    %95 = arith.truncf %94 : vector<8x32xf32> to vector<8x32xbf16>
    %cst_52 = arith.constant 2.000000e+01 : bf16
    %96 = vector.broadcast %cst_52 : bf16 to vector<8x32xbf16>
    %97 = arith.minimumf %95, %96 : vector<8x32xbf16>
    %98 = math.exp %97 : vector<8x32xbf16>
    %cst_53 = arith.constant 1.000000e+00 : bf16
    %99 = vector.broadcast %cst_53 : bf16 to vector<8x32xbf16>
    %100 = arith.addf %99, %98 : vector<8x32xbf16>
    %101 = arith.mulf %100, %100 : vector<8x32xbf16>
    %cst_54 = arith.constant 1.000000e+00 : bf16
    %102 = vector.broadcast %cst_54 : bf16 to vector<8x32xbf16>
    %103 = arith.subf %101, %102 : vector<8x32xbf16>
    %104 = arith.mulf %95, %103 : vector<8x32xbf16>
    %cst_55 = arith.constant 1.000000e+00 : bf16
    %105 = vector.broadcast %cst_55 : bf16 to vector<8x32xbf16>
    %106 = arith.addf %101, %105 : vector<8x32xbf16>
    %107 = arith.divf %104, %106 : vector<8x32xbf16>
    %108 = arith.extf %107 : vector<8x32xbf16> to vector<8x32xf32>
    %c1_56 = arith.constant 1 : index
    %c0_57 = arith.constant 0 : index
    %c0_58 = arith.constant 0 : index
    %109 = vector.load %arg8[%c1_56, %c0_57, %c0_58] : memref<2x1x32xf32, #tpu.memory_space<vmem>>, vector<1x1x32xf32>
    %110 = vector.shape_cast %109 : vector<1x1x32xf32> to vector<1x32xf32>
    %111 = vector.broadcast %110 : vector<1x32xf32> to vector<8x32xf32>
    %112 = arith.mulf %108, %111 : vector<8x32xf32>
    %cst_59 = arith.constant dense<0.000000e+00> : vector<8xf32>
    %113 = vector.multi_reduction <add>, %112, %cst_59 [1] : vector<8x32xf32> to vector<8xf32>
    %114 = vector.shape_cast %113 : vector<8xf32> to vector<8x1xf32>
    %115 = tpu.concatenate %66, %114 in 1 : vector<8x1xf32>, vector<8x1xf32> -> vector<8x2xf32>
    %c0_60 = arith.constant 0 : index
    %c0_61 = arith.constant 0 : index
    %116 = vector.load %arg9[%c0_60, %c0_61] : memref<1x2xf32, #tpu.memory_space<vmem>>, vector<1x2xf32>
    %117 = vector.broadcast %116 : vector<1x2xf32> to vector<8x2xf32>
    %118 = arith.addf %115, %117 : vector<8x2xf32>
    %c0_62 = arith.constant 0 : index
    %c0_63 = arith.constant 0 : index
    %119 = vector.load %arg10[%c0_62, %c0_63] : memref<8x2xf32, #tpu.memory_space<vmem>>, vector<8x2xf32>
    tpu.vector_store %arg10[%c0_62, %c0_63], %118 {strides = array<i32>} : memref<8x2xf32, #tpu.memory_space<vmem>>, vector<8x2xf32>,
    return
  }
  func.func @transform_0(%arg0: i32) -> (i32, i32) {
    %c0_i32 = arith.constant 0 : i32
    %c0_i32_0 = arith.constant 0 : i32
    return %arg0, %c0_i32 : i32, i32
  }
  func.func @transform_1(%arg0: i32) -> (i32, i32) {
    %c0_i32 = arith.constant 0 : i32
    %c0_i32_0 = arith.constant 0 : i32
    %c0_i32_1 = arith.constant 0 : i32
    return %c0_i32, %c0_i32_0 : i32, i32
  }
  func.func @transform_2(%arg0: i32) -> (i32, i32) {
    %c0_i32 = arith.constant 0 : i32
    %c0_i32_0 = arith.constant 0 : i32
    %c0_i32_1 = arith.constant 0 : i32
    return %c0_i32, %c0_i32_0 : i32, i32
  }
  func.func @transform_3(%arg0: i32) -> (i32, i32, i32) {
    %c0_i32 = arith.constant 0 : i32
    %c0_i32_0 = arith.constant 0 : i32
    %c0_i32_1 = arith.constant 0 : i32
    %c0_i32_2 = arith.constant 0 : i32
    return %c0_i32, %c0_i32_0, %c0_i32_1 : i32, i32, i32
  }
  func.func @transform_4(%arg0: i32) -> (i32, i32, i32) {
    %c0_i32 = arith.constant 0 : i32
    %c0_i32_0 = arith.constant 0 : i32
    %c0_i32_1 = arith.constant 0 : i32
    %c0_i32_2 = arith.constant 0 : i32
    return %c0_i32, %c0_i32_0, %c0_i32_1 : i32, i32, i32
  }
  func.func @transform_5(%arg0: i32) -> (i32, i32, i32) {
    %c0_i32 = arith.constant 0 : i32
    %c0_i32_0 = arith.constant 0 : i32
    %c0_i32_1 = arith.constant 0 : i32
    %c0_i32_2 = arith.constant 0 : i32
    return %c0_i32, %c0_i32_0, %c0_i32_1 : i32, i32, i32
  }
  func.func @transform_6(%arg0: i32) -> (i32, i32, i32) {
    %c0_i32 = arith.constant 0 : i32
    %c0_i32_0 = arith.constant 0 : i32
    %c0_i32_1 = arith.constant 0 : i32
    %c0_i32_2 = arith.constant 0 : i32
    return %c0_i32, %c0_i32_0, %c0_i32_1 : i32, i32, i32
  }
  func.func @transform_7(%arg0: i32) -> (i32, i32, i32) {
    %c0_i32 = arith.constant 0 : i32
    %c0_i32_0 = arith.constant 0 : i32
    %c0_i32_1 = arith.constant 0 : i32
    %c0_i32_2 = arith.constant 0 : i32
    return %c0_i32, %c0_i32_0, %c0_i32_1 : i32, i32, i32
  }
  func.func @transform_8(%arg0: i32) -> (i32, i32) {
    %c0_i32 = arith.constant 0 : i32
    %c0_i32_0 = arith.constant 0 : i32
    %c0_i32_1 = arith.constant 0 : i32
    return %c0_i32, %c0_i32_0 : i32, i32
  }
  func.func @transform_9(%arg0: i32) -> (i32, i32) {
    %c0_i32 = arith.constant 0 : i32
    %c0_i32_0 = arith.constant 0 : i32
    return %arg0, %c0_i32 : i32, i32
  }
}

</mosaic_0001>

<bundles_post_ra>
// kernel: tpu_custom_call.1
= control target key start
LH: loop header
LB: loop body
LE: loop exit
PB: predicated region body
PF: predicated region fallthrough
CT: control target
= control target key end

     0   :  { %14 = vsyncpa [#allocation3], 0  ;;  %s915_s0 = inlined_call_operand.hbm [shape: bf16[8,16], index: 0, kind: input, shape index: {}]   ;;  %s916_s1 = inlined_call_operand.hbm [shape: bf16[16,64], index: 1, kind: input, shape index: {}]   ;;  %s917_s2 = inlined_call_operand.vmem [shape: f32[1,64], index: 2, kind: input, shape index: {}]   ;;  %s918_s3 = inlined_call_operand.hbm [shape: bf16[2,32,32], index: 3, kind: input, shape index: {}]   ;;  %s919_s4 = inlined_call_operand.vmem [shape: f32[2,1,32], index: 4, kind: input, shape index: {}]   ;;  %s920_s5 = inlined_call_operand.hbm [shape: bf16[2,32,32], index: 5, kind: input, shape index: {}]   ;;  %s921_s6 = inlined_call_operand.vmem [shape: f32[2,1,32], index: 6, kind: input, shape index: {}]   ;;  %s922_s7 = inlined_call_operand.vmem [shape: f32[2,1,32], index: 7, kind: input, shape index: {}]   ;;  %s923_s8 = inlined_call_operand.vmem [shape: f32[1,2], index: 8, kind: input, shape index: {}]   ;;  %s924_s9 = inlined_call_operand.vmem [shape: f32[8,2], index: 9, kind: output, shape index: {}]  }
   0x1   :  { %15 = vsyncpa [#allocation5], 0 }
   0x2   :  { %16 = vsyncpa [#allocation8], 0  ;;  %s735_s30 = smov [#allocation4]   ;;  %s641_s13 = scalar_lea.hbm %s916_s1, 128 }
   0x3   :  { %s32_s10 = sshll.u32 %s735_s30, 4  ;;  %p642_p0 = scmp.ne.s32.totalorder %s916_s1, %s641_s13  ;;  %s33_s10 = int_to_ptr.vmem [resolvable:$true] %s32_s10 }
   0x4   :  { %p645_p1 = scmp.lt.u32.totalorder %s641_s13, %s916_s1 }
   0x6   :  { %p647_p2 = pnand %p645_p1, %p642_p0 }
   0x8   :  { %650 = shalt.err (!%p647_p2)
}
   0x9   :  { %s651_s18 = scalar_lea.vmem %s33_s10, 128  ;;  %p656_p4 = scmp.lt.s32.totalorder %s33_s10, %s33_s10 }
   0xa   :  { %p652_p3 = scmp.ne.s32.totalorder %s33_s10, %s651_s18  ;;  %p657_p5 = scmp.lt.s32.totalorder %s651_s18, %s651_s18 }
   0xc   :  { %p658_p6 = por %p657_p5, %p656_p4 }
   0xe   :  { %p659_p7 = pnand %p658_p6, %p652_p3 }
  0x10   :  { %662 = shalt.err (!%p659_p7)
}
  0x11   :  { %s736_s19 = smov 64   ;;  %s737_s20 = smov 4  }
  0x12   :  { %38 = dma.hbm_to_vmem [thread:$0]  %s916_s1, 128, %s33_s10, [#allocation5], %s736_s19, %s736_s19, %s737_s20  }
  0x13   :  { %s738_s23 = smov [#allocation2]   ;;  %s739_s25 = smov [#allocation6]  }
  0x14   :  { %s23_s24 = sshll.u32 %s738_s23, 4  ;;  %s46_s26 = sshll.u32 %s739_s25, 4  ;;  %s24_s24 = int_to_ptr.vmem [resolvable:$true] %s23_s24  ;;  %s47_s26 = int_to_ptr.vmem [resolvable:$true] %s46_s26 }
  0x15   :  { %s663_s29 = scalar_lea.hbm %s915_s0, 64 }
  0x16   :  { %p664_p8 = scmp.ne.s32.totalorder %s915_s0, %s663_s29  ;;  %p667_p9 = scmp.lt.u32.totalorder %s663_s29, %s915_s0 }
  0x18   :  { %p669_p10 = pnand %p667_p9, %p664_p8 }
  0x1a   :  { %672 = shalt.err (!%p669_p10)
}
  0x1b   :  { %s673_s1 = scalar_lea.vmem %s24_s24, 64  ;;  %p678_p12 = scmp.lt.s32.totalorder %s24_s24, %s24_s24 }
  0x1c   :  { %p674_p11 = scmp.ne.s32.totalorder %s24_s24, %s673_s1  ;;  %p679_p13 = scmp.lt.s32.totalorder %s673_s1, %s673_s1 }
  0x1e   :  { %p680_p0 = por %p679_p13, %p678_p12 }
  0x20   :  { %p681_p1 = pnand %p680_p0, %p674_p11 }
  0x22   :  { %684 = shalt.err (!%p681_p1)
}
  0x23   :  { %26 = dma.hbm_to_vmem [thread:$0]  %s915_s0, 64, %s24_s24, [#allocation3]  }
  0x24   :  { %s685_s17 = scalar_lea.hbm %s918_s3, 512 }
  0x25   :  { %p686_p2 = scmp.ne.s32.totalorder %s918_s3, %s685_s17  ;;  %p689_p3 = scmp.lt.u32.totalorder %s685_s17, %s918_s3 }
  0x27   :  { %p691_p4 = pnand %p689_p3, %p686_p2 }
  0x29   :  { %694 = shalt.err (!%p691_p4)
}
  0x2a   :  { %s695_s25 = scalar_lea.vmem %s47_s26, 512  ;;  %p700_p6 = scmp.lt.s32.totalorder %s47_s26, %s47_s26 }
  0x2b   :  { %p696_p5 = scmp.ne.s32.totalorder %s47_s26, %s695_s25  ;;  %p701_p7 = scmp.lt.s32.totalorder %s695_s25, %s695_s25 }
  0x2d   :  { %p702_p8 = por %p701_p7, %p700_p6 }
  0x2f   :  { %p703_p9 = pnand %p702_p8, %p696_p5 }
  0x31   :  { %706 = shalt.err (!%p703_p9)
}
  0x32   :  { %52 = dma.hbm_to_vmem [thread:$0]  %s918_s3, 512, %s47_s26, [#allocation5], %s736_s19, %s736_s19, %s737_s20  }
  0x33   :  { %s740_s27 = smov [#allocation7]   ;;  %s707_s11 = scalar_lea.hbm %s920_s5, 512 }
  0x34   :  { %s60_s28 = sshll.u32 %s740_s27, 4  ;;  %p708_p10 = scmp.ne.s32.totalorder %s920_s5, %s707_s11  ;;  %s61_s28 = int_to_ptr.vmem [resolvable:$true] %s60_s28 }
  0x35   :  { %p711_p11 = scmp.lt.u32.totalorder %s707_s11, %s920_s5 }
  0x37   :  { %p713_p12 = pnand %p711_p11, %p708_p10 }
  0x39   :  { %716 = shalt.err (!%p713_p12)
}
  0x3a   :  { %s717_s14 = scalar_lea.vmem %s61_s28, 512  ;;  %p722_p0 = scmp.lt.s32.totalorder %s61_s28, %s61_s28 }
  0x3b   :  { %p718_p13 = scmp.ne.s32.totalorder %s61_s28, %s717_s14  ;;  %p723_p1 = scmp.lt.s32.totalorder %s717_s14, %s717_s14 }
  0x3d   :  { %p724_p2 = por %p723_p1, %p722_p0 }
  0x3f   :  { %p725_p3 = pnand %p724_p2, %p718_p13 }
  0x41   :  { %728 = shalt.err (!%p725_p3)
}
  0x42   :  { %66 = dma.hbm_to_vmem [thread:$0]  %s920_s5, 512, %s61_s28, [#allocation8], %s736_s19, %s736_s19, %s737_s20  }
  0x43   :  { %729 = dma.done.wait [#allocation3], 64  }
  0x44   :  { %730 = vsyncadd [#allocation3], 4294967232 }
  0x45   :  { %731 = dma.done.wait [#allocation5], 640  }
  0x46   :  { %732 = vsyncadd [#allocation5], 4294966656 }
  0x47   :  { %733 = dma.done.wait [#allocation8], 512  }
  0x48   :  { %734 = vsyncadd [#allocation8], 4294966784  ;;  %v741_v0 = vmov 0.0   ;;  %vm742_vm0 = vmmov 0   ;;  %v612_v1 = vld [vmem:[#allocation4] sm:$0xff]   ;;  %vm104_vm1 = vcmask 130048  }
  0x49   :  { %563 = vmatprep.subr.bf16.mxu0 %v741_v0  ;;  %565 = vmatprep.mubr.msk.bf16.mxu0 %vm742_vm0, %v741_v0  ;;  %v88_v2 = vld [vmem:[#allocation2] sm:$0xf]  ;;  %v613_v3 = vld [vmem:[#allocation6] sm:$0xff]   ;;  %v614_v4 = vld [vmem:[#allocation6 + $0x8] sm:$0xff]   ;;  %v743_v12 = vmov 1101021600  }
  0x4a   :  { %569 = vmatprep.subr.bf16.mxu1 %v741_v0  ;;  %573 = vmatprep.mubr.msk.bf16.mxu1 %vm742_vm0, %v741_v0  ;;  %v524_v5 = vld [vmem:[%s917_s2] ss:$0 sm:$0xff]  ;;  %v744_v19 = vmov 1065369472   ;;  %vm183_vm2 = vcmask 261120   ;;  %v615_v23 = vld [vmem:[#allocation6 + $0x10] sm:$0xff]  }
  0x4b   :  { %564 = vmatpush3.bf16.msra.mxu0 %v612_v1  ;;  %570 = vmatpush3.bf16.msra.mxu1 %v613_v3  ;;  %s745_s2 = smov 96   ;;  %v616_v25 = vld [vmem:[#allocation6 + $0x18] sm:$0xff]   ;;  %v617_v27 = vld [vmem:[#allocation7] sm:$0xff]   ;;  %v618_v28 = vld [vmem:[#allocation7 + $0x8] sm:$0xff]   ;;  %vm505_vm3 = vcmask 7168   ;;  %vm515_vm4 = vcmask 15360  }
  0x4c   :  { %577 = vmatprep.subr.bf16.mxu0 %v741_v0  ;;  %571 = vmatprep.subr.bf16.mxu1 %v741_v0  ;;  %v527_v29 = vld [vmem:[%s919_s4] ss:$0 sm:$0xff]  ;;  %v619_v45 = vld [vmem:[#allocation7 + $0x10] sm:$0xff]   ;;  %v620_v47 = vld [vmem:[#allocation7 + $0x18] sm:$0xff]  }
  0x4d   :  { %v537_v48 = vld [vmem:[%s919_s4 + $0x1] ss:$0 sm:$0xff]  ;;  %v531_v1 = vld [vmem:[%s921_s6] ss:$0 sm:$0xff] }
  0x4e   :  { %566 = vmatmul.mubr.msk.bf16.vlgmr.msra.gmra.mrb[0].mxu0 %vm104_vm1, %v88_v2 }
  0x4f   :  { %581 = vmatprep.mubr.msk.bf16.mxu0 %vm742_vm0, %v741_v0  ;;  %572 = vmatpush3.bf16.msra.mxu1 %v614_v4 }
  0x50   :  { %585 = vmatprep.subr.bf16.mxu1 %v741_v0  ;;  %578 = vmatpush3.bf16.msra.mxu0 %v617_v27 }
  0x51   :  { %579 = vmatprep.subr.bf16.mxu0 %v741_v0 }
  0x54   :  { %580 = vmatpush3.bf16.msra.mxu0 %v618_v28 }
  0x55   :  { %593 = vmatprep.subr.bf16.mxu0 %v741_v0 }
 0x121   :  { %v142_v6 = vpop.f32.mrb[0].mxu0 }
 0x122   :  { %v143_v7 = vadd.f32 %v524_v5, %v142_v6  ;;  %v567_v8 = vpop.f32.mrb[1].mxu0 }
 0x123   :  { %v145_v9 = vpop.f32.mrb[2].mxu0 }
 0x124   :  { %v148_v10 = vpack.c.bf16 %v143_v7, %v143_v7  ;;  %v568_v11 = vpop.f32.mrb[3].mxu0 }
 0x126   :  { %v149_v13 = vmin.bf16 %v743_v12, %v148_v10 }
 0x128   :  { %v151_v14 = vmul.bf16 1069105081, %v149_v13 }
 0x12a   :  { %621 = vpow.bf16 %v151_v14 }
 0x135   :  { %v622_v15 = vpop.eup %621 }
 0x136   :  { %v153_v16 = vadd.bf16 1065369472, %v622_v15 }
 0x138   :  { %v154_v17 = vmul.bf16 %v153_v16, %v153_v16 }
 0x13a   :  { %v157_v18 = vadd.bf16 1065369472, %v154_v17  ;;  %v155_v20 = vsub.bf16 %v154_v17, %v744_v19 }
 0x13c   :  { %623 = vrcp.bf16 %v157_v18  ;;  %v156_v21 = vmul.bf16 %v155_v20, %v148_v10  ;;  %v535_v20 = vld [vmem:[%s922_s7] ss:$0 sm:$0xff] }
 0x147   :  { %v624_v22 = vpop.eup %623 }
 0x148   :  { %v159_v24 = vmul.bf16 %v624_v22, %v156_v21 }
 0x14a   :  { %343 = vrot.lane.b32.xlu0 %v159_v24, %s745_s2  ;;  %574 = vmatmul.mubr.msk.bf16.vlgmr.msra.gmra.mrb[0].mxu1 %vm183_vm2, %v159_v24  ;;  %v542_v24 = vld [vmem:[%s921_s6 + $0x1] ss:$0 sm:$0xff] }
 0x14b   :  { %586 = vmatpush3.bf16.msra.mxu1 %v615_v23  ;;  %589 = vmatprep.mubr.msk.bf16.mxu1 %vm742_vm0, %v741_v0 }
 0x14c   :  { %587 = vmatprep.subr.bf16.mxu1 %v741_v0 }
 0x14f   :  { %588 = vmatpush3.bf16.msra.mxu1 %v616_v25 }
 0x1bc   :  { %v344_v26 = vpop.permute.xlu0 %343 }
 0x1bd   :  { %590 = vmatmul.mubr.msk.bf16.vlgmr.msra.gmra.mrb[4].mxu1 %vm183_vm2, %v344_v26 }
 0x21d   :  { %v221_v30 = vpop.f32.mrb[0].mxu1 }
 0x21e   :  { %v222_v31 = vadd.f32 %v527_v29, %v221_v30  ;;  %v575_v32 = vpop.f32.mrb[1].mxu1 }
 0x21f   :  { %v224_v33 = vpop.f32.mrb[2].mxu1 }
 0x220   :  { %v227_v34 = vpack.c.bf16 %v222_v31, %v222_v31  ;;  %v576_v35 = vpop.f32.mrb[3].mxu1 }
 0x222   :  { %v228_v36 = vmin.bf16 %v743_v12, %v227_v34 }
 0x224   :  { %v230_v37 = vmul.bf16 1069105081, %v228_v36 }
 0x226   :  { %625 = vpow.bf16 %v230_v37 }
 0x231   :  { %v626_v38 = vpop.eup %625 }
 0x232   :  { %v232_v39 = vadd.bf16 1065369472, %v626_v38 }
 0x234   :  { %v233_v40 = vmul.bf16 %v232_v39, %v232_v39 }
 0x236   :  { %v236_v41 = vadd.bf16 1065369472, %v233_v40  ;;  %v234_v42 = vsub.bf16 %v233_v40, %v744_v19 }
 0x238   :  { %627 = vrcp.bf16 %v236_v41  ;;  %v235_v43 = vmul.bf16 %v234_v42, %v227_v34  ;;  %v547_v41 = vld [vmem:[%s922_s7 + $0x1] ss:$0 sm:$0xff] }
 0x243   :  { %v628_v44 = vpop.eup %627 }
 0x244   :  { %v238_v46 = vmul.bf16 %v628_v44, %v235_v43  ;;  %v548_v44 = vld [vmem:[%s923_s8] ss:$0 sm:$0xff] }
 0x246   :  { %582 = vmatmul.mubr.msk.bf16.vlgmr.msra.gmra.mrb[4].mxu0 %vm183_vm2, %v238_v46 }
 0x247   :  { %594 = vmatpush3.bf16.msra.mxu0 %v619_v45  ;;  %597 = vmatprep.mubr.msk.bf16.mxu0 %vm742_vm0, %v741_v0 }
 0x248   :  { %595 = vmatprep.subr.bf16.mxu0 %v741_v0 }
 0x24b   :  { %596 = vmatpush3.bf16.msra.mxu0 %v620_v47 }
 0x290   :  { %v394_v49 = vpop.f32.mrb[4].mxu1 }
 0x291   :  { %v395_v50 = vadd.f32 %v537_v48, %v394_v49  ;;  %v591_v51 = vpop.f32.mrb[5].mxu1 }
 0x292   :  { %v397_v52 = vpop.f32.mrb[6].mxu1 }
 0x293   :  { %v400_v53 = vpack.c.bf16 %v395_v50, %v395_v50  ;;  %v592_v54 = vpop.f32.mrb[7].mxu1 }
 0x295   :  { %v401_v55 = vmin.bf16 %v743_v12, %v400_v53 }
 0x297   :  { %v403_v56 = vmul.bf16 1069105081, %v401_v55 }
 0x299   :  { %629 = vpow.bf16 %v403_v56 }
 0x2a4   :  { %v630_v57 = vpop.eup %629 }
 0x2a5   :  { %v405_v58 = vadd.bf16 1065369472, %v630_v57 }
 0x2a7   :  { %v406_v59 = vmul.bf16 %v405_v58, %v405_v58 }
 0x2a9   :  { %v409_v60 = vadd.bf16 1065369472, %v406_v59  ;;  %v407_v61 = vsub.bf16 %v406_v59, %v744_v19 }
 0x2ab   :  { %631 = vrcp.bf16 %v409_v60  ;;  %v408_v62 = vmul.bf16 %v407_v61, %v400_v53 }
 0x2b6   :  { %v632_v63 = vpop.eup %631 }
 0x2b7   :  { %v411_v0 = vmul.bf16 %v632_v63, %v408_v62 }
 0x2b9   :  { %598 = vmatmul.mubr.msk.bf16.vlgmr.msra.gmra.mrb[8].mxu0 %vm183_vm2, %v411_v0 }
 0x319   :  { %v299_v2 = vpop.f32.mrb[4].mxu0 }
 0x31a   :  { %v300_v3 = vadd.f32 %v531_v1, %v299_v2  ;;  %v583_v4 = vpop.f32.mrb[5].mxu0 }
 0x31b   :  { %v302_v5 = vpop.f32.mrb[6].mxu0 }
 0x31c   :  { %v305_v6 = vpack.c.bf16 %v300_v3, %v300_v3  ;;  %v584_v7 = vpop.f32.mrb[7].mxu0 }
 0x31e   :  { %v306_v8 = vmin.bf16 %v743_v12, %v305_v6 }
 0x320   :  { %v308_v9 = vmul.bf16 1069105081, %v306_v8 }
 0x322   :  { %633 = vpow.bf16 %v308_v9 }
 0x32d   :  { %v634_v10 = vpop.eup %633 }
 0x32e   :  { %v310_v11 = vadd.bf16 1065369472, %v634_v10 }
 0x330   :  { %v311_v13 = vmul.bf16 %v310_v11, %v310_v11 }
 0x332   :  { %v314_v14 = vadd.bf16 1065369472, %v311_v13  ;;  %v312_v15 = vsub.bf16 %v311_v13, %v744_v19 }
 0x334   :  { %635 = vrcp.bf16 %v314_v14  ;;  %v313_v16 = vmul.bf16 %v312_v15, %v305_v6 }
 0x33f   :  { %v636_v17 = vpop.eup %635 }
 0x340   :  { %v316_v18 = vmul.bf16 %v636_v17, %v313_v16 }
 0x342   :  { %v317_v21 = vunpack.c.l.bf16 %v316_v18 }
 0x344   :  { %v325_v22 = vmul.f32 %v535_v20, %v317_v21 }
 0x346   :  { %v326_v23 = vsel %vm183_vm2, %v325_v22, 0.0 }
 0x347   :  { %327 = vadd.xlane.f32.xlu0 %v326_v23 }
 0x38c   :  { %v474_v25 = vpop.f32.mrb[8].mxu0 }
 0x38d   :  { %v475_v26 = vadd.f32 %v542_v24, %v474_v25  ;;  %v599_v27 = vpop.f32.mrb[9].mxu0 }
 0x38e   :  { %v477_v28 = vpop.f32.mrb[10].mxu0 }
 0x38f   :  { %v480_v29 = vpack.c.bf16 %v475_v26, %v475_v26  ;;  %v600_v30 = vpop.f32.mrb[11].mxu0 }
 0x391   :  { %v481_v31 = vmin.bf16 %v743_v12, %v480_v29 }
 0x393   :  { %v483_v32 = vmul.bf16 1069105081, %v481_v31 }
 0x395   :  { %637 = vpow.bf16 %v483_v32 }
 0x3a0   :  { %v638_v33 = vpop.eup %637 }
 0x3a1   :  { %v485_v34 = vadd.bf16 1065369472, %v638_v33 }
 0x3a3   :  { %v486_v35 = vmul.bf16 %v485_v34, %v485_v34 }
 0x3a5   :  { %v489_v36 = vadd.bf16 1065369472, %v486_v35  ;;  %v487_v37 = vsub.bf16 %v486_v35, %v744_v19 }
 0x3a7   :  { %639 = vrcp.bf16 %v489_v36  ;;  %v488_v38 = vmul.bf16 %v487_v37, %v480_v29 }
 0x3b2   :  { %v640_v39 = vpop.eup %639 }
 0x3b3   :  { %v491_v40 = vmul.bf16 %v640_v39, %v488_v38 }
 0x3b5   :  { %v492_v42 = vunpack.c.l.bf16 %v491_v40 }
 0x3b7   :  { %v501_v43 = vmul.f32 %v547_v41, %v492_v42 }
 0x3b9   :  { %v502_v12 = vsel %vm183_vm2, %v501_v43, 0.0 }
 0x3ba   :  { %503 = vadd.xlane.f32.xlu1 %v502_v12 }
 0x3d4   :  { %v328_v45 = vpop.xlane.xlu0 %327 }
 0x447   :  { %v504_v46 = vpop.xlane.xlu1 %503 }
 0x448   :  { %v506_v19 = vsel %vm505_vm3, %v328_v45, %v504_v46 }
 0x449   :  { %v514_v47 = vadd.f32 %v548_v44, %v506_v19 }
 0x44b   :  { %516 = vst.msk [vmem:[%s924_s9] sm:$0xff] %vm515_vm4, %v514_v47 }
 0x44c   :  { %521 = vsyncpa [#allocation3], 1 }
 0x44d   :  { %522 = vsyncpa [#allocation5], 1 }
 0x44e   :  { %523 = vsyncpa [#allocation8], 1 }

</bundles_post_ra>
